<compile_context>
chip_gen: v7x
topology: tpu7x:2x2x1
jax: 0.10.0
libtpu: 0.0.40
codegen_flags: <defaults>
</compile_context>

<pallas_src>
import functools

import jax
import jax.numpy as jnp
from jax.experimental import pallas as pl
from jax.experimental.pallas import tpu as pltpu


def _round_up(x, m):
    return (x + m - 1) // m * m


def _pad_to(x, shape, dtype):
    """Zero-pad `x` to `shape` / cast to `dtype`, skipping no-op copies."""
    x = x.astype(dtype)
    if tuple(x.shape) == tuple(shape):
        return x
    out = jnp.zeros(shape, dtype)
    return out.at[tuple(slice(0, s) for s in x.shape)].set(x)


def dec_kernel(x_ref, w_ref, ct_ref, csq_ref, out_ref, acc_ref, *,
               alpha, num_clusters, num_clusters_padded):
    k = pl.program_id(1)

    # Readout (partial over the F reduction axis):
    #   emb += x_tile[bf16] @ W_tile[bf16]   (MXU, f32 accumulation)
    partial = jnp.dot(x_ref[...], w_ref[...],
                      preferred_element_type=jnp.float32)

    @pl.when(k == 0)
    def _():
        acc_ref[...] = partial          # first step: write, no zero-init pass

    @pl.when(k > 0)
    def _():
        acc_ref[...] += partial

    # Cluster assignment only once the embedding is complete.
    @pl.when(k == pl.num_programs(1) - 1)
    def _():
        emb = acc_ref[...]                                      # [TB, Dp] f32

        # ||e - c||^2 = ||e||^2 - 2 e.c + ||c||^2
        # centers are pre-transposed ([Dp, Kp]) and ||c||^2 precomputed.
        e_sq = jnp.sum(emb * emb, axis=1, keepdims=True)        # [TB, 1]
        cross = jnp.dot(emb, ct_ref[...],
                        preferred_element_type=jnp.float32)     # [TB, Kp]
        norm_sq = jnp.maximum(e_sq - 2.0 * cross + csq_ref[...], 0.0)

        # Student's t-distribution kernel.
        base = 1.0 + norm_sq * (1.0 / alpha)
        if alpha == 1.0:
            # power == 1  ->  base ** -1, no transcendentals needed.
            numerator = pl.reciprocal(base, approx=False)
        else:
            power = (alpha + 1.0) / 2.0
            numerator = jnp.exp(-power * jnp.log(base))         # base**(-power)

        # Mask the zero-padded cluster columns out of the denominator.
        if num_clusters != num_clusters_padded:
            col = jax.lax.broadcasted_iota(jnp.int32, numerator.shape, 1)
            numerator = jnp.where(col < num_clusters, numerator, 0.0)

        denom = jnp.sum(numerator, axis=1, keepdims=True)
        out_ref[...] = numerator * pl.reciprocal(denom, approx=False)


def dec_forward(x_nchw, w_readout, cluster_centers, *, alpha=1.0,
                tile_b=256, tile_f=None, compute_dtype=jnp.bfloat16,
                tile_budget_bytes=16 * 1024 * 1024):
    """DEC forward: NCHW batch -> soft cluster assignments [B, K]."""
    B = x_nchw.shape[0]
    x_flat = x_nchw.reshape(B, -1)                              # torch.flatten(x, 1)
    F = x_flat.shape[1]
    D = w_readout.shape[1]
    K = cluster_centers.shape[0]

    # Tile / padding geometry (lane-dense: D, K padded to 128; F padded to
    # the reduction tile; B padded to the batch tile).
    tile_b = min(tile_b, _round_up(B, 8))
    B_pad = _round_up(B, tile_b)
    D_pad = _round_up(D, 128)
    K_pad = _round_up(K, 128)

    # Auto-size the F reduction tile to fill a double-buffered VMEM budget:
    #   bytes/unit tile_f = 2 buffers * 2 B (bf16) * (tile_b + D_pad)
    per_f_bytes = 4 * (tile_b + D_pad)
    max_tile_f = max(128, (tile_budget_bytes // per_f_bytes) // 128 * 128)
    if tile_f is None:
        tile_f = max_tile_f
    tile_f = max(128, min(tile_f, max_tile_f, _round_up(F, 128)) // 128 * 128)
    F_pad = _round_up(F, tile_f)

    # Zero-padding is mathematically inert for dot products / squared norms.
    x_p = _pad_to(x_flat, (B_pad, F_pad), compute_dtype)
    w_p = _pad_to(w_readout, (F_pad, D_pad), compute_dtype)
    c_p = _pad_to(cluster_centers, (K_pad, D_pad), jnp.float32)
    centers_t = c_p.T                                           # [Dp, Kp], hoisted transpose
    c_sq = jnp.sum(c_p * c_p, axis=1)[None, :]                  # [1, Kp], hoisted ||c||^2

    grid = (B_pad // tile_b, F_pad // tile_f)

    flops = int(2 * B_pad * F_pad * D_pad + 2 * B_pad * D_pad * K_pad)
    transcendentals = 0 if float(alpha) == 1.0 else int(2 * B_pad * K_pad)
    bytes_accessed = int(
        x_p.size * x_p.dtype.itemsize
        + grid[0] * w_p.size * w_p.dtype.itemsize
        + grid[0] * (centers_t.size * 4 + c_sq.size * 4)
        + B_pad * K_pad * 4)

    kernel = functools.partial(
        dec_kernel, alpha=float(alpha), num_clusters=K,
        num_clusters_padded=K_pad)

    out = pl.pallas_call(
        kernel,
        out_shape=jax.ShapeDtypeStruct((B_pad, K_pad), jnp.float32),
        grid_spec=pltpu.PrefetchScalarGridSpec(
            num_scalar_prefetch=0,
            grid=grid,                                          # (batch tiles, F tiles)
            in_specs=[
                pl.BlockSpec((tile_b, tile_f), lambda i, k: (i, k)),   # x tile
                pl.BlockSpec((tile_f, D_pad), lambda i, k: (k, 0)),    # readout weights
                pl.BlockSpec((D_pad, K_pad), lambda i, k: (0, 0)),     # centers^T (resident)
                pl.BlockSpec((1, K_pad), lambda i, k: (0, 0)),         # ||c||^2 (resident)
            ],
            out_specs=pl.BlockSpec((tile_b, K_pad), lambda i, k: (i, 0)),
            scratch_shapes=[pltpu.VMEM((tile_b, D_pad), jnp.float32)],  # emb accumulator
        ),
        compiler_params=pltpu.CompilerParams(
            dimension_semantics=("parallel", "arbitrary"),
            vmem_limit_bytes=32 * 1024 * 1024,
        ),
        cost_estimate=pl.CostEstimate(
            flops=flops, transcendentals=transcendentals,
            bytes_accessed=bytes_accessed),
    )(x_p, w_p, centers_t, c_sq)

    return out[:B, :K]


def dec_reference(x_nchw, w_readout, cluster_centers, alpha=1.0,
                  compute_dtype=jnp.bfloat16):
    """Pure-JAX reference matching the PyTorch semantics (with the same
    bf16 quantization of the readout inputs as the kernel)."""
    B = x_nchw.shape[0]
    x = x_nchw.reshape(B, -1).astype(compute_dtype).astype(jnp.float32)
    w = w_readout.astype(compute_dtype).astype(jnp.float32)
    emb = x @ w                                                  # [B, D]
    diff = emb[:, None, :] - cluster_centers[None, :, :].astype(jnp.float32)
    norm_sq = jnp.sum(diff * diff, axis=2)                       # [B, K]
    num = (1.0 + norm_sq / alpha) ** (-(alpha + 1.0) / 2.0)
    return num / jnp.sum(num, axis=1, keepdims=True)


if __name__ == "__main__":
    # Small, forward-consistent shapes.
    B, C, H, W = 8, 4, 16, 16          # NCHW input batch
    HIDDEN = 32                        # hidden_dimension (embedding size)
    K = 8                              # cluster_number
    ALPHA = 1.0
    F = C * H * W

    key = jax.random.PRNGKey(0)
    kx, kw, kc = jax.random.split(key, 3)
    x = jax.random.normal(kx, (B, C, H, W), dtype=jnp.float32)
    # Deterministic parameter init (synthetic; no checkpoint load).
    w_readout = jax.random.normal(kw, (F, HIDDEN), dtype=jnp.float32) * 0.02
    cluster_centers = jax.random.normal(kc, (K, HIDDEN), dtype=jnp.float32)

    q = dec_forward(x, w_readout, cluster_centers, alpha=ALPHA)
    q = jax.block_until_ready(q)

    q_ref = dec_reference(x, w_readout, cluster_centers, alpha=ALPHA)
    assert q.shape == (B, K)
    assert jnp.allclose(jnp.sum(q, axis=1), 1.0, atol=1e-5)
    assert jnp.allclose(q, q_ref, rtol=1e-4, atol=1e-5)

    print("KERNEL_OK")
</pallas_src>

<mosaic_0001>
module attributes {stable_mosaic.version = 11 : i64} {
  func.func @dec_kernel(%arg0: i32, %arg1: i32, %arg2: memref<8x1024xbf16, #tpu.memory_space<vmem>>, %arg3: memref<1024x128xbf16, #tpu.memory_space<vmem>>, %arg4: memref<128x128xf32, #tpu.memory_space<vmem>>, %arg5: memref<1x128xf32, #tpu.memory_space<vmem>>, %arg6: memref<8x128xf32, #tpu.memory_space<vmem>>, %arg7: memref<8x128xf32, #tpu.memory_space<vmem>>) attributes {dimension_semantics = [#tpu.dimension_semantics<parallel>, #tpu.dimension_semantics<arbitrary>], iteration_bounds = array<i64: 1, 1>, scalar_prefetch = 0 : i64, scratch_operands = 1 : i64, tpu.core_type = #tpu.core_type<tc>, window_params = [{transform_indices = @transform_0, window_bounds = array<i64: 8, 1024>}, {transform_indices = @transform_1, window_bounds = array<i64: 1024, 128>}, {pipeline_mode = #tpu.pipeline_mode<synchronous>, transform_indices = @transform_2, window_bounds = array<i64: 128, 128>}, {pipeline_mode = #tpu.pipeline_mode<synchronous>, transform_indices = @transform_3, window_bounds = array<i64: 1, 128>}, {transform_indices = @transform_4, window_bounds = array<i64: 8, 128>}]} {
    %c0 = arith.constant 0 : index
    %c0_0 = arith.constant 0 : index
    %0 = vector.load %arg2[%c0, %c0_0] : memref<8x1024xbf16, #tpu.memory_space<vmem>>, vector<8x1024xbf16>
    %c0_1 = arith.constant 0 : index
    %c0_2 = arith.constant 0 : index
    %1 = vector.load %arg3[%c0_1, %c0_2] : memref<1024x128xbf16, #tpu.memory_space<vmem>>, vector<1024x128xbf16>
    %cst = arith.constant dense<0.000000e+00> : vector<8x128xf32>
    %2 = tpu.matmul %0, %1, %cst {dimension_numbers = #tpu.dot_dimension_numbers<[1], [0], [0], [1], [0, 0, 1, 1], [], []>} : vector<8x1024xbf16>, vector<1024x128xbf16>, vector<8x128xf32> -> vector<8x128xf32>
    %c0_i32 = arith.constant 0 : i32
    %3 = arith.cmpi eq, %arg1, %c0_i32 : i32
    %4 = arith.extui %3 : i1 to i32
    %c0_i32_3 = arith.constant 0 : i32
    %5 = arith.cmpi ne, %4, %c0_i32_3 : i32
    scf.if %5 {
      %c0_8 = arith.constant 0 : index
      %c0_9 = arith.constant 0 : index
      %12 = vector.load %arg7[%c0_8, %c0_9] : memref<8x128xf32, #tpu.memory_space<vmem>>, vector<8x128xf32>
      tpu.vector_store %arg7[%c0_8, %c0_9], %2 {strides = array<i32>} : memref<8x128xf32, #tpu.memory_space<vmem>>, vector<8x128xf32>,
    } else {
    }
    %c0_i32_4 = arith.constant 0 : i32
    %6 = arith.cmpi sgt, %arg1, %c0_i32_4 : i32
    %7 = arith.extui %6 : i1 to i32
    %c0_i32_5 = arith.constant 0 : i32
    %8 = arith.cmpi ne, %7, %c0_i32_5 : i32
    scf.if %8 {
      %c0_8 = arith.constant 0 : index
      %c0_9 = arith.constant 0 : index
      %12 = vector.load %arg7[%c0_8, %c0_9] : memref<8x128xf32, #tpu.memory_space<vmem>>, vector<8x128xf32>
      %13 = arith.addf %12, %2 : vector<8x128xf32>
      %c0_10 = arith.constant 0 : index
      %c0_11 = arith.constant 0 : index
      %14 = vector.load %arg7[%c0_10, %c0_11] : memref<8x128xf32, #tpu.memory_space<vmem>>, vector<8x128xf32>
      tpu.vector_store %arg7[%c0_10, %c0_11], %13 {strides = array<i32>} : memref<8x128xf32, #tpu.memory_space<vmem>>, vector<8x128xf32>,
    } else {
    }
    %c0_i32_6 = arith.constant 0 : i32
    %9 = arith.cmpi eq, %arg1, %c0_i32_6 : i32
    %10 = arith.extui %9 : i1 to i32
    %c0_i32_7 = arith.constant 0 : i32
    %11 = arith.cmpi ne, %10, %c0_i32_7 : i32
    scf.if %11 {
      %c0_8 = arith.constant 0 : index
      %c0_9 = arith.constant 0 : index
      %12 = vector.load %arg7[%c0_8, %c0_9] : memref<8x128xf32, #tpu.memory_space<vmem>>, vector<8x128xf32>
      %13 = arith.mulf %12, %12 : vector<8x128xf32>
      %cst_10 = arith.constant dense<0.000000e+00> : vector<8xf32>
      %14 = vector.multi_reduction <add>, %13, %cst_10 [1] : vector<8x128xf32> to vector<8xf32>
      %15 = vector.shape_cast %14 : vector<8xf32> to vector<8x1xf32>
      %c0_11 = arith.constant 0 : index
      %c0_12 = arith.constant 0 : index
      %16 = vector.load %arg4[%c0_11, %c0_12] : memref<128x128xf32, #tpu.memory_space<vmem>>, vector<128x128xf32>
      %cst_13 = arith.constant dense<0.000000e+00> : vector<8x128xf32>
      %17 = tpu.matmul %12, %16, %cst_13 {dimension_numbers = #tpu.dot_dimension_numbers<[1], [0], [0], [1], [0, 0, 1, 1], [], []>} : vector<8x128xf32>, vector<128x128xf32>, vector<8x128xf32> -> vector<8x128xf32>
      %cst_14 = arith.constant 2.000000e+00 : f32
      %18 = vector.broadcast %cst_14 : f32 to vector<8x128xf32>
      %19 = arith.mulf %18, %17 : vector<8x128xf32>
      %20 = vector.broadcast %15 : vector<8x1xf32> to vector<8x128xf32>
      %21 = arith.subf %20, %19 : vector<8x128xf32>
      %c0_15 = arith.constant 0 : index
      %c0_16 = arith.constant 0 : index
      %22 = vector.load %arg5[%c0_15, %c0_16] : memref<1x128xf32, #tpu.memory_space<vmem>>, vector<1x128xf32>
      %23 = vector.broadcast %22 : vector<1x128xf32> to vector<8x128xf32>
      %24 = arith.addf %21, %23 : vector<8x128xf32>
      %cst_17 = arith.constant 0.000000e+00 : f32
      %25 = vector.broadcast %cst_17 : f32 to vector<8x128xf32>
      %26 = arith.maximumf %24, %25 : vector<8x128xf32>
      %cst_18 = arith.constant 1.000000e+00 : f32
      %27 = vector.broadcast %cst_18 : f32 to vector<8x128xf32>
      %28 = arith.mulf %26, %27 : vector<8x128xf32>
      %cst_19 = arith.constant 1.000000e+00 : f32
      %29 = vector.broadcast %cst_19 : f32 to vector<8x128xf32>
      %30 = arith.addf %29, %28 : vector<8x128xf32>
      %31 = tpu.reciprocal %30 : vector<8x128xf32> -> vector<8x128xf32>
      %32 = tpu.iota {dimensions = array<i32: 1>} : vector<8x128xi32>
      %c8_i32 = arith.constant 8 : i32
      %33 = vector.broadcast %c8_i32 : i32 to vector<8x128xi32>
      %34 = arith.cmpi slt, %32, %33 : vector<8x128xi32>
      %cst_20 = arith.constant 0.000000e+00 : f32
      %35 = vector.broadcast %cst_20 : f32 to vector<8x128xf32>
      %36 = arith.select %34, %31, %35 : vector<8x128xi1>, vector<8x128xf32>
      %cst_21 = arith.constant dense<0.000000e+00> : vector<8xf32>
      %37 = vector.multi_reduction <add>, %36, %cst_21 [1] : vector<8x128xf32> to vector<8xf32>
      %38 = vector.shape_cast %37 : vector<8xf32> to vector<8x1xf32>
      %39 = tpu.reciprocal %38 : vector<8x1xf32> -> vector<8x1xf32>
      %40 = vector.broadcast %39 : vector<8x1xf32> to vector<8x128xf32>
      %41 = arith.mulf %36, %40 : vector<8x128xf32>
      %c0_22 = arith.constant 0 : index
      %c0_23 = arith.constant 0 : index
      %42 = vector.load %arg6[%c0_22, %c0_23] : memref<8x128xf32, #tpu.memory_space<vmem>>, vector<8x128xf32>
      tpu.vector_store %arg6[%c0_22, %c0_23], %41 {strides = array<i32>} : memref<8x128xf32, #tpu.memory_space<vmem>>, vector<8x128xf32>,
    } else {
    }
    return
  }
  func.func @transform_0(%arg0: i32, %arg1: i32) -> (i32, i32) {
    %c0_i32 = arith.constant 0 : i32
    return %arg0, %arg1 : i32, i32
  }
  func.func @transform_1(%arg0: i32, %arg1: i32) -> (i32, i32) {
    %c0_i32 = arith.constant 0 : i32
    %c0_i32_0 = arith.constant 0 : i32
    return %arg1, %c0_i32 : i32, i32
  }
  func.func @transform_2(%arg0: i32, %arg1: i32) -> (i32, i32) {
    %c0_i32 = arith.constant 0 : i32
    %c0_i32_0 = arith.constant 0 : i32
    %c0_i32_1 = arith.constant 0 : i32
    return %c0_i32, %c0_i32_0 : i32, i32
  }
  func.func @transform_3(%arg0: i32, %arg1: i32) -> (i32, i32) {
    %c0_i32 = arith.constant 0 : i32
    %c0_i32_0 = arith.constant 0 : i32
    %c0_i32_1 = arith.constant 0 : i32
    return %c0_i32, %c0_i32_0 : i32, i32
  }
  func.func @transform_4(%arg0: i32, %arg1: i32) -> (i32, i32) {
    %c0_i32 = arith.constant 0 : i32
    %c0_i32_0 = arith.constant 0 : i32
    return %arg0, %c0_i32 : i32, i32
  }
}

</mosaic_0001>

<bundles_post_ra>
// kernel: tpu_custom_call.1
= control target key start
LH: loop header
LB: loop body
LE: loop exit
PB: predicated region body
PF: predicated region fallthrough
CT: control target
= control target key end

     0   :  { %9 = vsyncpa [#allocation4], 0  ;;  %s1410_s0 = inlined_call_operand.hbm [shape: bf16[8,1024], index: 0, kind: input, shape index: {}]   ;;  %s1411_s1 = inlined_call_operand.hbm [shape: bf16[1024,128], index: 1, kind: input, shape index: {}]   ;;  %s1412_s2 = inlined_call_operand.hbm [shape: f32[128,128], index: 2, kind: input, shape index: {}]   ;;  %s1413_s3 = inlined_call_operand.vmem [shape: f32[1,128], index: 3, kind: input, shape index: {}]   ;;  %s1414_s4 = inlined_call_operand.hbm [shape: f32[8,128], index: 4, kind: output, shape index: {}]  }
   0x1   :  { %10 = vsyncpa [#allocation7], 0 }
   0x2   :  { %11 = vsyncpa [#allocation5], 0  ;;  %s1323_s15 = smov [#allocation6]   ;;  %s1229_s19 = scalar_lea.hbm %s1411_s1, 8192 }
   0x3   :  { %s27_s16 = sshll.u32 %s1323_s15, 4  ;;  %p1230_p0 = scmp.ne.s32.totalorder %s1411_s1, %s1229_s19  ;;  %s28_s16 = int_to_ptr.vmem [resolvable:$true] %s27_s16 }
   0x4   :  { %p1233_p1 = scmp.lt.u32.totalorder %s1229_s19, %s1411_s1 }
   0x6   :  { %p1235_p2 = pnand %p1233_p1, %p1230_p0 }
   0x8   :  { %1238 = shalt.err (!%p1235_p2)
}
   0x9   :  { %s1239_s24 = scalar_lea.vmem %s28_s16, 8192  ;;  %p1244_p4 = scmp.lt.s32.totalorder %s28_s16, %s28_s16 }
   0xa   :  { %p1240_p3 = scmp.ne.s32.totalorder %s28_s16, %s1239_s24  ;;  %p1245_p5 = scmp.lt.s32.totalorder %s1239_s24, %s1239_s24 }
   0xc   :  { %p1246_p6 = por %p1245_p5, %p1244_p4 }
   0xe   :  { %p1247_p7 = pnand %p1246_p6, %p1240_p3 }
  0x10   :  { %1250 = shalt.err (!%p1247_p7)
}
  0x11   :  { %s1324_s25 = smov 64   ;;  %s1325_s26 = smov 4  }
  0x12   :  { %33 = dma.hbm_to_vmem [thread:$0]  %s1411_s1, 8192, %s28_s16, [#allocation7], %s1324_s25, %s1324_s25, %s1325_s26  }
  0x13   :  { %s1326_s29 = smov [#allocation3]   ;;  %s1327_s5 = smov [#allocation8]  }
  0x14   :  { %s18_s30 = sshll.u32 %s1326_s29, 4  ;;  %s39_s6 = sshll.u32 %s1327_s5, 4  ;;  %s19_s30 = int_to_ptr.vmem [resolvable:$true] %s18_s30  ;;  %s40_s6 = int_to_ptr.vmem [resolvable:$true] %s39_s6 }
  0x15   :  { %s1251_s9 = scalar_lea.hbm %s1410_s0, 512 }
  0x16   :  { %p1252_p8 = scmp.ne.s32.totalorder %s1410_s0, %s1251_s9  ;;  %p1255_p9 = scmp.lt.u32.totalorder %s1251_s9, %s1410_s0 }
  0x18   :  { %p1257_p10 = pnand %p1255_p9, %p1252_p8 }
  0x1a   :  { %1260 = shalt.err (!%p1257_p10)
}
  0x1b   :  { %s1261_s1 = scalar_lea.vmem %s19_s30, 512  ;;  %p1266_p12 = scmp.lt.s32.totalorder %s19_s30, %s19_s30 }
  0x1c   :  { %p1262_p11 = scmp.ne.s32.totalorder %s19_s30, %s1261_s1  ;;  %p1267_p13 = scmp.lt.s32.totalorder %s1261_s1, %s1261_s1 }
  0x1e   :  { %p1268_p0 = por %p1267_p13, %p1266_p12 }
  0x20   :  { %p1269_p1 = pnand %p1268_p0, %p1262_p11 }
  0x22   :  { %1272 = shalt.err (!%p1269_p1)
}
  0x23   :  { %21 = dma.hbm_to_vmem [thread:$0]  %s1410_s0, 512, %s19_s30, [#allocation4]  }
  0x24   :  { %s1273_s18 = scalar_lea.hbm %s1412_s2, 2048 }
  0x25   :  { %p1274_p2 = scmp.ne.s32.totalorder %s1412_s2, %s1273_s18  ;;  %p1277_p3 = scmp.lt.u32.totalorder %s1273_s18, %s1412_s2 }
  0x27   :  { %p1279_p4 = pnand %p1277_p3, %p1274_p2 }
  0x29   :  { %1282 = shalt.err (!%p1279_p4)
}
  0x2a   :  { %s1283_s23 = scalar_lea.vmem %s40_s6, 2048  ;;  %p1288_p6 = scmp.lt.s32.totalorder %s40_s6, %s40_s6 }
  0x2b   :  { %p1284_p5 = scmp.ne.s32.totalorder %s40_s6, %s1283_s23  ;;  %p1289_p7 = scmp.lt.s32.totalorder %s1283_s23, %s1283_s23 }
  0x2d   :  { %p1290_p8 = por %p1289_p7, %p1288_p6 }
  0x2f   :  { %p1291_p9 = pnand %p1290_p8, %p1284_p5 }
  0x31   :  { %1294 = shalt.err (!%p1291_p9)
}
  0x32   :  { %s1328_s0 = smov 128   ;;  %s1329_s24 = smov 8  }
  0x33   :  { %45 = dma.hbm_to_vmem [thread:$0]  %s1412_s2, 2048, %s40_s6, [#allocation7], %s1328_s0, %s1328_s0, %s1329_s24  }
  0x34   :  { %1317 = dma.done.wait [#allocation4], 512  }
  0x35   :  { %1318 = vsyncadd [#allocation4], 4294966784 }
  0x36   :  { %1319 = dma.done.wait [#allocation7], 10240  }
  0x37   :  { %1320 = vsyncadd [#allocation7], 4294957056  ;;  %v1153_v0 = vld [vmem:[#allocation6 + $0x40] sm:$0xff]   ;;  %v1157_v4 = vld [vmem:[#allocation6 + $0x48] sm:$0xff]   ;;  %vm1331_vm0 = vmmov 0   ;;  %s1333_s28 = smov [#allocation9]  }
  0x38   :  { %v1154_v1 = vld [vmem:[#allocation6 + $0xc0] sm:$0xff]   ;;  %978 = vmatprep.subr.bf16.mxu0 %v1153_v0  ;;  %v1158_v5 = vld [vmem:[#allocation6 + $0xc8] sm:$0xff]   ;;  %v1161_v8 = vld [vmem:[#allocation6 + $0x50] sm:$0xff]   ;;  %s895_s29 = sshll.u32 %s1333_s28, 4  ;;  %s896_s29 = int_to_ptr.vmem [resolvable:$true] %s895_s29 }
  0x39   :  { %v1155_v2 = vld [vmem:[#allocation6] sm:$0xff]   ;;  %1000 = vmatprep.subr.bf16.mxu1 %v1154_v1  ;;  %v1159_v6 = vld [vmem:[#allocation6 + $0x8] sm:$0xff]   ;;  %v1162_v9 = vld [vmem:[#allocation6 + $0xd0] sm:$0xff]   ;;  %p1300_p11 = scmp.lt.s32.totalorder %s896_s29, %s896_s29 }
  0x3a   :  { %v1156_v3 = vld [vmem:[#allocation6 + $0x80] sm:$0xff]   ;;  %979 = vmatpush3.bf16.msra.mxu0 %v1155_v2  ;;  %v1160_v7 = vld [vmem:[#allocation6 + $0x88] sm:$0xff]   ;;  %v1163_v10 = vld [vmem:[#allocation6 + $0x10] sm:$0xff]  }
  0x3b   :  { %1001 = vmatpush3.bf16.msra.mxu1 %v1156_v3  ;;  %980 = vmatprep.subr.bf16.mxu0 %v1157_v4  ;;  %v1164_v11 = vld [vmem:[#allocation6 + $0x90] sm:$0xff]   ;;  %v1165_v12 = vld [vmem:[#allocation6 + $0x58] sm:$0xff]   ;;  %v1169_v16 = vld [vmem:[#allocation6 + $0x60] sm:$0xff]  }
  0x3c   :  { %1002 = vmatprep.subr.bf16.mxu1 %v1158_v5  ;;  %v1166_v13 = vld [vmem:[#allocation6 + $0xd8] sm:$0xff]   ;;  %v1170_v17 = vld [vmem:[#allocation6 + $0xe0] sm:$0xff]   ;;  %v1173_v20 = vld [vmem:[#allocation6 + $0x68] sm:$0xff]  }
  0x3d   :  { %v1167_v14 = vld [vmem:[#allocation6 + $0x18] sm:$0xff]   ;;  %v1171_v18 = vld [vmem:[#allocation6 + $0x20] sm:$0xff]   ;;  %v1174_v21 = vld [vmem:[#allocation6 + $0xe8] sm:$0xff]  }
  0x3e   :  { %981 = vmatpush3.bf16.msra.mxu0 %v1159_v6  ;;  %v1168_v15 = vld [vmem:[#allocation6 + $0x98] sm:$0xff]   ;;  %v1172_v19 = vld [vmem:[#allocation6 + $0xa0] sm:$0xff]   ;;  %v1175_v22 = vld [vmem:[#allocation6 + $0x28] sm:$0xff]  }
  0x3f   :  { %1003 = vmatpush3.bf16.msra.mxu1 %v1160_v7  ;;  %982 = vmatprep.subr.bf16.mxu0 %v1161_v8  ;;  %v1176_v23 = vld [vmem:[#allocation6 + $0xa8] sm:$0xff]   ;;  %v1177_v24 = vld [vmem:[#allocation6 + $0x70] sm:$0xff]   ;;  %v1181_v28 = vld [vmem:[#allocation6 + $0x78] sm:$0xff]  }
  0x40   :  { %1004 = vmatprep.subr.bf16.mxu1 %v1162_v9  ;;  %v1178_v25 = vld [vmem:[#allocation6 + $0xf0] sm:$0xff]   ;;  %v1182_v29 = vld [vmem:[#allocation6 + $0xf8] sm:$0xff]   ;;  %v58_v32 = vld [vmem:[#allocation3] sm:$0xff] }
  0x41   :  { %v1179_v26 = vld [vmem:[#allocation6 + $0x30] sm:$0xff]   ;;  %v1183_v30 = vld [vmem:[#allocation6 + $0x38] sm:$0xff]   ;;  %v59_v33 = vld [vmem:[#allocation3 + $0x8] sm:$0xff]  ;;  %v905_v34 = vcombine.low %v58_v32, %v58_v32  ;;  %v906_v35 = vcombine.high %v58_v32, %v58_v32 }
  0x42   :  { %983 = vmatpush3.bf16.msra.mxu0 %v1163_v10  ;;  %v1180_v27 = vld [vmem:[#allocation6 + $0xb0] sm:$0xff]   ;;  %v1184_v31 = vld [vmem:[#allocation6 + $0xb8] sm:$0xff]   ;;  %v907_v36 = vcombine.low %v59_v33, %v59_v33  ;;  %v908_v37 = vcombine.high %v59_v33, %v59_v33  ;;  %v1189_v38 = vld [vmem:[#allocation6 + $0x140] sm:$0xff]  }
  0x43   :  { %1005 = vmatpush3.bf16.msra.mxu1 %v1164_v11  ;;  %984 = vmatprep.subr.bf16.mxu0 %v1165_v12  ;;  %v1190_v39 = vld [vmem:[#allocation6 + $0x1c0] sm:$0xff]   ;;  %v1193_v42 = vld [vmem:[#allocation6 + $0x148] sm:$0xff]   ;;  %v1197_v46 = vld [vmem:[#allocation6 + $0x150] sm:$0xff]  }
  0x44   :  { %1006 = vmatprep.subr.bf16.mxu1 %v1166_v13  ;;  %634 = vmatprep.mubr.bf16.mxu0 %v906_v35  ;;  %v1191_v40 = vld [vmem:[#allocation6 + $0x100] sm:$0xff]   ;;  %v1194_v43 = vld [vmem:[#allocation6 + $0x1c8] sm:$0xff]   ;;  %v1198_v47 = vld [vmem:[#allocation6 + $0x1d0] sm:$0xff]  }
  0x45   :  { %674 = vmatprep.mubr.bf16.mxu1 %v908_v37  ;;  %v1192_v41 = vld [vmem:[#allocation6 + $0x180] sm:$0xff]   ;;  %v1195_v44 = vld [vmem:[#allocation6 + $0x108] sm:$0xff]   ;;  %v1199_v48 = vld [vmem:[#allocation6 + $0x110] sm:$0xff]   ;;  %v1332_v37 = vmov 0.0  }
  0x46   :  { %985 = vmatpush3.bf16.msra.mxu0 %v1167_v14  ;;  %v1196_v45 = vld [vmem:[#allocation6 + $0x188] sm:$0xff]   ;;  %v1200_v49 = vld [vmem:[#allocation6 + $0x190] sm:$0xff]   ;;  %v1201_v50 = vld [vmem:[#allocation6 + $0x158] sm:$0xff]  }
  0x47   :  { %1007 = vmatpush3.bf16.msra.mxu1 %v1168_v15  ;;  %986 = vmatprep.subr.bf16.mxu0 %v1169_v16  ;;  %v1202_v51 = vld [vmem:[#allocation6 + $0x1d8] sm:$0xff]   ;;  %v1205_v54 = vld [vmem:[#allocation6 + $0x160] sm:$0xff]   ;;  %v1209_v58 = vld [vmem:[#allocation6 + $0x168] sm:$0xff]   ;;  %v1330_v15 = vmov 0.0|0.0  }
  0x48   :  { %1008 = vmatprep.subr.bf16.mxu1 %v1170_v17  ;;  %v1203_v52 = vld [vmem:[#allocation6 + $0x118] sm:$0xff]   ;;  %v1206_v55 = vld [vmem:[#allocation6 + $0x1e0] sm:$0xff]   ;;  %v1210_v59 = vld [vmem:[#allocation6 + $0x1e8] sm:$0xff]  }
  0x49   :  { %v1204_v53 = vld [vmem:[#allocation6 + $0x198] sm:$0xff]   ;;  %v1207_v56 = vld [vmem:[#allocation6 + $0x120] sm:$0xff]   ;;  %v1211_v60 = vld [vmem:[#allocation6 + $0x128] sm:$0xff]  }
  0x4a   :  { %987 = vmatpush3.bf16.msra.mxu0 %v1171_v18  ;;  %v1208_v57 = vld [vmem:[#allocation6 + $0x1a0] sm:$0xff]   ;;  %v1212_v61 = vld [vmem:[#allocation6 + $0x1a8] sm:$0xff]   ;;  %v1213_v62 = vld [vmem:[#allocation6 + $0x170] sm:$0xff]  }
  0x4b   :  { %1009 = vmatpush3.bf16.msra.mxu1 %v1172_v19  ;;  %988 = vmatprep.subr.bf16.mxu0 %v1173_v20  ;;  %v1214_v63 = vld [vmem:[#allocation6 + $0x1f0] sm:$0xff]   ;;  %v1217_v2 = vld [vmem:[#allocation6 + $0x178] sm:$0xff]   ;;  %v781_v12 = vld [vmem:[#allocation8] sm:$0xff] }
  0x4c   :  { %1010 = vmatprep.subr.bf16.mxu1 %v1174_v21  ;;  %v1215_v0 = vld [vmem:[#allocation6 + $0x130] sm:$0xff]   ;;  %v1218_v3 = vld [vmem:[#allocation6 + $0x1f8] sm:$0xff]   ;;  %v782_v13 = vld [vmem:[#allocation8 + $0x8] sm:$0xff] }
  0x4d   :  { %v1216_v1 = vld [vmem:[#allocation6 + $0x1b0] sm:$0xff]   ;;  %v1219_v4 = vld [vmem:[#allocation6 + $0x138] sm:$0xff]   ;;  %v1119_v16 = vpack.c.bf16 %v782_v13, %v781_v12  ;;  %v785_v19 = vld [vmem:[#allocation8 + $0x20] sm:$0xff] }
  0x4e   :  { %989 = vmatpush3.bf16.msra.mxu0 %v1175_v22  ;;  %v1220_v5 = vld [vmem:[#allocation6 + $0x1b8] sm:$0xff]   ;;  %v60_v6 = vld [vmem:[#allocation3 + $0x10] sm:$0xff]  ;;  %v786_v20 = vld [vmem:[#allocation8 + $0x28] sm:$0xff] }
  0x4f   :  { %1011 = vmatpush3.bf16.msra.mxu1 %v1176_v23  ;;  %990 = vmatprep.subr.bf16.mxu0 %v1177_v24  ;;  %v909_v7 = vcombine.low %v60_v6, %v60_v6  ;;  %v910_v8 = vcombine.high %v60_v6, %v60_v6  ;;  %v61_v9 = vld [vmem:[#allocation3 + $0x18] sm:$0xff]  ;;  %v783_v14 = vld [vmem:[#allocation8 + $0x10] sm:$0xff]  ;;  %v1125_v21 = vpack.c.bf16 %v786_v20, %v785_v19  ;;  %v794_v32 = vld [vmem:[#allocation8 + $0x68] sm:$0xff] }
  0x50   :  { %1012 = vmatprep.subr.bf16.mxu1 %v1178_v25  ;;  %v911_v10 = vcombine.low %v61_v9, %v61_v9  ;;  %v912_v11 = vcombine.high %v61_v9, %v61_v9  ;;  %v784_v17 = vld [vmem:[#allocation8 + $0x18] sm:$0xff]  ;;  %v787_v22 = vld [vmem:[#allocation8 + $0x30] sm:$0xff]  ;;  %v789_v25 = vld [vmem:[#allocation8 + $0x40] sm:$0xff] }
  0x51   :  { %v1122_v18 = vpack.c.bf16 %v784_v17, %v783_v14  ;;  %v788_v23 = vld [vmem:[#allocation8 + $0x38] sm:$0xff] }
  0x52   :  { %991 = vmatpush3.bf16.msra.mxu0 %v1179_v26  ;;  %v1128_v24 = vpack.c.bf16 %v788_v23, %v787_v22  ;;  %v790_v26 = vld [vmem:[#allocation8 + $0x48] sm:$0xff]  ;;  %v796_v35 = vld [vmem:[#allocation8 + $0x78] sm:$0xff] }
  0x53   :  { %1013 = vmatpush3.bf16.msra.mxu1 %v1180_v27  ;;  %992 = vmatprep.subr.bf16.mxu0 %v1181_v28  ;;  %v1131_v27 = vpack.c.bf16 %v790_v26, %v789_v25  ;;  %v791_v28 = vld [vmem:[#allocation8 + $0x50] sm:$0xff] }
  0x54   :  { %1014 = vmatprep.subr.bf16.mxu1 %v1182_v29  ;;  %v792_v29 = vld [vmem:[#allocation8 + $0x58] sm:$0xff] }
  0x56   :  { %993 = vmatpush3.bf16.msra.mxu0 %v1183_v30  ;;  %v1134_v30 = vpack.c.bf16 %v792_v29, %v791_v28 }
  0x57   :  { %1015 = vmatpush3.bf16.msra.mxu1 %v1184_v31  ;;  %1022 = vmatprep.subr.bf16.mxu0 %v1189_v38  ;;  %v793_v31 = vld [vmem:[#allocation8 + $0x60] sm:$0xff] }
  0x58   :  { %1044 = vmatprep.subr.bf16.mxu1 %v1190_v39  ;;  %v1137_v33 = vpack.c.bf16 %v794_v32, %v793_v31 }
  0x59   :  { %635 = vmatmul.mubr.bf16.vlgmr.msra.gmra.mrb[0].mxu0 %v905_v34  ;;  %v795_v34 = vld [vmem:[#allocation8 + $0x70] sm:$0xff] }
  0x5a   :  { %675 = vmatmul.mubr.bf16.vlgmr.msra.gmra.mrb[0].mxu1 %v907_v36  ;;  %1023 = vmatpush3.bf16.msra.mxu0 %v1191_v40  ;;  %v1140_v36 = vpack.c.bf16 %v796_v35, %v795_v34 }
  0x5b   :  { %1045 = vmatpush3.bf16.msra.mxu1 %v1192_v41  ;;  %1024 = vmatprep.subr.bf16.mxu0 %v1193_v42 }
  0x5c   :  { %1046 = vmatprep.subr.bf16.mxu1 %v1194_v43  ;;  %714 = vmatprep.mubr.bf16.mxu0 %v910_v8 }
  0x5d   :  { %754 = vmatprep.mubr.bf16.mxu1 %v912_v11 }
  0x5e   :  { %1025 = vmatpush3.bf16.msra.mxu0 %v1195_v44 }
  0x5f   :  { %1047 = vmatpush3.bf16.msra.mxu1 %v1196_v45  ;;  %1026 = vmatprep.subr.bf16.mxu0 %v1197_v46 }
  0x60   :  { %1048 = vmatprep.subr.bf16.mxu1 %v1198_v47 }
  0x62   :  { %1027 = vmatpush3.bf16.msra.mxu0 %v1199_v48 }
  0x63   :  { %1049 = vmatpush3.bf16.msra.mxu1 %v1200_v49  ;;  %1028 = vmatprep.subr.bf16.mxu0 %v1201_v50 }
  0x64   :  { %1050 = vmatprep.subr.bf16.mxu1 %v1202_v51 }
  0x66   :  { %1029 = vmatpush3.bf16.msra.mxu0 %v1203_v52 }
  0x67   :  { %1051 = vmatpush3.bf16.msra.mxu1 %v1204_v53  ;;  %1030 = vmatprep.subr.bf16.mxu0 %v1205_v54 }
  0x68   :  { %1052 = vmatprep.subr.bf16.mxu1 %v1206_v55 }
  0x6a   :  { %1031 = vmatpush3.bf16.msra.mxu0 %v1207_v56 }
  0x6b   :  { %1053 = vmatpush3.bf16.msra.mxu1 %v1208_v57  ;;  %1032 = vmatprep.subr.bf16.mxu0 %v1209_v58 }
  0x6c   :  { %1054 = vmatprep.subr.bf16.mxu1 %v1210_v59 }
  0x6e   :  { %1033 = vmatpush3.bf16.msra.mxu0 %v1211_v60 }
  0x6f   :  { %1055 = vmatpush3.bf16.msra.mxu1 %v1212_v61  ;;  %1034 = vmatprep.subr.bf16.mxu0 %v1213_v62 }
  0x70   :  { %1056 = vmatprep.subr.bf16.mxu1 %v1214_v63 }
  0x72   :  { %1035 = vmatpush3.bf16.msra.mxu0 %v1215_v0 }
  0x73   :  { %1057 = vmatpush3.bf16.msra.mxu1 %v1216_v1  ;;  %1036 = vmatprep.subr.bf16.mxu0 %v1217_v2  ;;  %v977_v2 = vld [vmem:[%s1413_s3] ss:$0 sm:$0xff]  ;;  %s1295_s3 = scalar_lea.vmem %s896_s29, 128 }
  0x74   :  { %1058 = vmatprep.subr.bf16.mxu1 %v1218_v3  ;;  %p1296_p10 = scmp.ne.s32.totalorder %s896_s29, %s1295_s3  ;;  %p1301_p12 = scmp.lt.s32.totalorder %s1295_s3, %s1295_s3 }
  0x76   :  { %1037 = vmatpush3.bf16.msra.mxu0 %v1219_v4  ;;  %p1302_p13 = por %p1301_p12, %p1300_p11 }
  0x77   :  { %1059 = vmatpush3.bf16.msra.mxu1 %v1220_v5  ;;  %1118 = vmatprep.subr.bf16.mxu0 %v1330_v15 }
  0x78   :  { %p1303_p0 = pnand %p1302_p13, %p1296_p10 }
  0x79   :  { %715 = vmatmul.mubr.bf16.vlgmr.msra.gmra.mrb[4].mxu0 %v909_v7  ;;  %v880_v7 = vlaneseq }
  0x7a   :  { %755 = vmatmul.mubr.bf16.vlgmr.msra.gmra.mrb[4].mxu1 %v911_v10  ;;  %1120 = vmatpush3.bf16.msra.mxu0 %v1119_v16 }
  0x7b   :  { %1121 = vmatprep.subr.bf16.mxu0 %v1330_v15  ;;  %1115 = vmatprep.mubr.msk.f32.mxu0 %vm1331_vm0, %v1332_v37  ;;  %v881_v8 = vand.u32 127, %v880_v7 }
  0x7d   :  { %vm882_vm1 = vcmp.lt.s32.totalorder %v881_v8, 8 }
  0x7e   :  { %1123 = vmatpush3.bf16.msra.mxu0 %v1122_v18 }
  0x7f   :  { %1124 = vmatprep.subr.bf16.mxu0 %v1330_v15 }
  0x82   :  { %1126 = vmatpush3.bf16.msra.mxu0 %v1125_v21 }
  0x83   :  { %1127 = vmatprep.subr.bf16.mxu0 %v1330_v15 }
  0x86   :  { %1129 = vmatpush3.bf16.msra.mxu0 %v1128_v24 }
  0x87   :  { %1130 = vmatprep.subr.bf16.mxu0 %v1330_v15 }
  0x8a   :  { %1132 = vmatpush3.bf16.msra.mxu0 %v1131_v27 }
  0x8b   :  { %1133 = vmatprep.subr.bf16.mxu0 %v1330_v15 }
  0x8e   :  { %1135 = vmatpush3.bf16.msra.mxu0 %v1134_v30 }
  0x8f   :  { %1136 = vmatprep.subr.bf16.mxu0 %v1330_v15 }
  0x92   :  { %1138 = vmatpush3.bf16.msra.mxu0 %v1137_v33 }
  0x93   :  { %1139 = vmatprep.subr.bf16.mxu0 %v1330_v15 }
  0x96   :  { %1141 = vmatpush3.bf16.msra.mxu0 %v1140_v36 }
 0x12c   :  { %v994_v38 = vpop.f32.mrb[0].mxu0 }
 0x12d   :  { %v1016_v39 = vpop.f32.mrb[0].mxu1  ;;  %v995_v40 = vpop.f32.mrb[1].mxu0 }
 0x12e   :  { %v1017_v41 = vpop.f32.mrb[1].mxu1  ;;  %v996_v42 = vadd.f32 %v995_v40, %v994_v38  ;;  %v997_v44 = vpop.f32.mrb[2].mxu0 }
 0x12f   :  { %v1018_v43 = vadd.f32 %v1017_v41, %v1016_v39  ;;  %v1019_v45 = vpop.f32.mrb[2].mxu1  ;;  %v998_v46 = vpop.f32.mrb[3].mxu0 }
 0x130   :  { %v1020_v47 = vpop.f32.mrb[3].mxu1 }
 0x131   :  { %v677_v48 = vadd.f32 %v1018_v43, %v996_v42 }
 0x14c   :  { %v1038_v49 = vpop.f32.mrb[4].mxu0 }
 0x14d   :  { %v1060_v50 = vpop.f32.mrb[4].mxu1  ;;  %v1039_v51 = vpop.f32.mrb[5].mxu0 }
 0x14e   :  { %v1061_v52 = vpop.f32.mrb[5].mxu1  ;;  %v1040_v53 = vadd.f32 %v1039_v51, %v1038_v49  ;;  %v1041_v55 = vpop.f32.mrb[6].mxu0 }
 0x14f   :  { %v1062_v54 = vadd.f32 %v1061_v52, %v1060_v50  ;;  %v1063_v56 = vpop.f32.mrb[6].mxu1  ;;  %v1042_v57 = vpop.f32.mrb[7].mxu0 }
 0x150   :  { %v1064_v58 = vpop.f32.mrb[7].mxu1  ;;  %v717_v59 = vadd.f32 %v1040_v53, %v677_v48 }
 0x152   :  { %v757_v60 = vadd.f32 %v1062_v54, %v717_v59 }
 0x154   :  { %1116 = vmatmul.mubr.f32.vlgmr.msra.gmra.mrb[8].mxu0 %v757_v60  ;;  %v778_v61 = vmul.f32 %v757_v60, %v757_v60 }
 0x156   :  { %779 = vadd.xlane.f32.xlu0 %v778_v61 }
 0x1e3   :  { %v780_v1 = vpop.xlane.xlu0 %779 }
 0x227   :  { %v863_v62 = vpop.f32.mrb[8].mxu0 }
 0x228   :  { %v867_v63 = vmul.f32 2.0, %v863_v62  ;;  %v1117_v0 = vpop.f32.mrb[9].mxu0 }
 0x22a   :  { %v868_v3 = vsub.f32 %v780_v1, %v867_v63 }
 0x22c   :  { %v876_v4 = vadd.f32 %v977_v2, %v868_v3 }
 0x22e   :  { %v877_v5 = vmax.f32 %v876_v4, 0.0 }
 0x230   :  { %v878_v6 = vadd.f32 1.0, %v877_v5 }
 0x232   :  { %1225 = vrcp.f32 %v878_v6 }
 0x23c   :  { %v1226_v9 = vpop.eup %1225 }
 0x23d   :  { %v883_v10 = vsel %vm882_vm1, %v1226_v9, 0.0 }
 0x23e   :  { %884 = vadd.xlane.f32.xlu0 %v883_v10 }
 0x2cb   :  { %v885_v11 = vpop.xlane.xlu0 %884 }
 0x2cc   :  { %1227 = vrcp.f32 %v885_v11 }
 0x2d6   :  { %v1228_v12 = vpop.eup %1227 }
 0x2d7   :  { %v887_v13 = vmul.f32 %v1228_v12, %v883_v10 }
 0x2d9   :  { %888 = vst [vmem:[#allocation9] sm:$0xff] %v887_v13 }
 0x2da   :  { %1306 = shalt.err (!%p1303_p0)
}
 0x2db   :  { %s1307_s6 = scalar_lea.hbm %s1414_s4, 128 }
 0x2dc   :  { %p1308_p1 = scmp.ne.s32.totalorder %s1414_s4, %s1307_s6  ;;  %p1311_p2 = scmp.lt.u32.totalorder %s1307_s6, %s1414_s4 }
 0x2de   :  { %p1313_p3 = pnand %p1311_p2, %p1308_p1 }
 0x2e0   :  { %1316 = shalt.err (!%p1313_p3)
}
 0x2e1   :  { %898 = dma.vmem_to_hbm [thread:$0]  %s896_s29, 128, %s1414_s4, [#allocation5]  }
 0x2e2   :  { %1321 = dma.done.wait [#allocation5], 128  }
 0x2e3   :  { %1322 = vsyncadd [#allocation5], 4294967168 }
 0x2e4   :  { %902 = vsyncpa [#allocation4], 1 }
 0x2e5   :  { %903 = vsyncpa [#allocation7], 1 }
 0x2e6   :  { %904 = vsyncpa [#allocation5], 1 }

</bundles_post_ra>
